<compile_context>
chip_gen: v7x
topology: tpu7x:2x2x1
jax: 0.10.0
libtpu: 0.0.40
codegen_flags: <defaults>
</compile_context>

<pallas_src>
import math

import jax
import jax.numpy as jnp
from jax.experimental import pallas as pl
from jax.experimental.pallas import tpu as pltpu


_LANE = 1024            # lane-dense last dim, multiple of 128
_MAX_BLOCK_ROWS = 512   # 512 x 1024 f32 = 2 MiB/block -> ~8 MiB resident double-buffered


def _lrelu_kernel(x_ref, o_ref):
    x = x_ref[...]
    # torch.max(x * 0.2, x)  ==  leaky ReLU with negative slope 0.2
    o_ref[...] = jnp.maximum(x * 0.2, x)


def lrelu(x):
    """Elementwise max(0.2*x, x) via a Pallas TPU kernel. Works for any shape/float dtype."""
    orig_shape = x.shape
    orig_dtype = x.dtype
    total = math.prod(orig_shape) if orig_shape else 1
    itemsize = jnp.dtype(orig_dtype).itemsize

    # Sublane granularity: 8 for 4-byte, 16 for 2-byte (bf16 packing), 32 for 1-byte.
    sub = max(8, 32 // max(itemsize, 1))

    # Flatten to a lane-dense 2-D slab (rows, _LANE); pad so blocks divide exactly.
    rows = -(-total // _LANE)
    block_rows = min(_MAX_BLOCK_ROWS, -(-rows // sub) * sub)
    padded_rows = -(-rows // block_rows) * block_rows
    padded_total = padded_rows * _LANE

    flat = jnp.ravel(x)
    if padded_total != total:
        flat = jnp.pad(flat, (0, padded_total - total))
    x2d = flat.reshape(padded_rows, _LANE)

    grid = (padded_rows // block_rows,)
    cost = pl.CostEstimate(
        flops=2 * padded_total,
        transcendentals=0,
        bytes_accessed=2 * padded_total * itemsize,
    )

    out2d = pl.pallas_call(
        _lrelu_kernel,
        out_shape=jax.ShapeDtypeStruct((padded_rows, _LANE), orig_dtype),
        grid_spec=pltpu.PrefetchScalarGridSpec(
            num_scalar_prefetch=0,
            grid=grid,
            in_specs=[pl.BlockSpec((block_rows, _LANE), lambda i: (i, 0))],
            out_specs=pl.BlockSpec((block_rows, _LANE), lambda i: (i, 0)),
        ),
        compiler_params=pltpu.CompilerParams(
            dimension_semantics=("parallel",),
        ),
        cost_estimate=cost,
    )(x2d)

    return out2d.reshape(-1)[:total].reshape(orig_shape)


if __name__ == "__main__":
    key = jax.random.PRNGKey(0)
    x = jax.random.normal(key, (2, 4, 16, 16), dtype=jnp.float32)

    out = lrelu(x)
    out = jax.block_until_ready(out)

    # reference check (plain JAX)
    ref = jnp.maximum(x * 0.2, x)
    assert out.shape == x.shape and out.dtype == x.dtype
    assert jnp.allclose(out, ref, atol=1e-6), "mismatch vs reference"

    print("KERNEL_OK")
</pallas_src>

<mosaic_0001>
module attributes {stable_mosaic.version = 11 : i64} {
  func.func @_lrelu_kernel(%arg0: i32, %arg1: memref<8x1024xf32, #tpu.memory_space<vmem>>, %arg2: memref<8x1024xf32, #tpu.memory_space<vmem>>) attributes {dimension_semantics = [#tpu.dimension_semantics<parallel>], iteration_bounds = array<i64: 1>, scalar_prefetch = 0 : i64, scratch_operands = 0 : i64, tpu.core_type = #tpu.core_type<tc>, window_params = [{transform_indices = @transform_0, window_bounds = array<i64: 8, 1024>}, {transform_indices = @transform_1, window_bounds = array<i64: 8, 1024>}]} {
    %c0 = arith.constant 0 : index
    %c0_0 = arith.constant 0 : index
    %0 = vector.load %arg1[%c0, %c0_0] : memref<8x1024xf32, #tpu.memory_space<vmem>>, vector<8x1024xf32>
    %cst = arith.constant 2.000000e-01 : f32
    %1 = vector.broadcast %cst : f32 to vector<8x1024xf32>
    %2 = arith.mulf %0, %1 : vector<8x1024xf32>
    %3 = arith.maximumf %2, %0 : vector<8x1024xf32>
    %c0_1 = arith.constant 0 : index
    %c0_2 = arith.constant 0 : index
    %4 = vector.load %arg2[%c0_1, %c0_2] : memref<8x1024xf32, #tpu.memory_space<vmem>>, vector<8x1024xf32>
    tpu.vector_store %arg2[%c0_1, %c0_2], %3 {strides = array<i32>} : memref<8x1024xf32, #tpu.memory_space<vmem>>, vector<8x1024xf32>,
    return
  }
  func.func @transform_0(%arg0: i32) -> (i32, i32) {
    %c0_i32 = arith.constant 0 : i32
    %c0_i32_0 = arith.constant 0 : i32
    return %arg0, %c0_i32 : i32, i32
  }
  func.func @transform_1(%arg0: i32) -> (i32, i32) {
    %c0_i32 = arith.constant 0 : i32
    %c0_i32_0 = arith.constant 0 : i32
    return %arg0, %c0_i32 : i32, i32
  }
}

</mosaic_0001>

<bundles_post_ra>
// kernel: tpu_custom_call.1
= control target key start
LH: loop header
LB: loop body
LE: loop exit
PB: predicated region body
PF: predicated region fallthrough
CT: control target
= control target key end

     0   :  { %6 = vsyncpa [#allocation3], 0  ;;  %s154_s0 = inlined_call_operand.hbm [shape: f32[8,1024], index: 0, kind: input, shape index: {}]   ;;  %s155_s1 = inlined_call_operand.hbm [shape: f32[8,1024], index: 1, kind: output, shape index: {}]  }
   0x1   :  { %7 = vsyncpa [#allocation4], 0  ;;  %s118_s6 = smov [#allocation2]   ;;  %s70_s10 = scalar_lea.hbm %s154_s0, 1024 }
   0x2   :  { %s14_s7 = sshll.u32 %s118_s6, 4  ;;  %p71_p0 = scmp.ne.s32.totalorder %s154_s0, %s70_s10  ;;  %s15_s7 = int_to_ptr.vmem [resolvable:$true] %s14_s7 }
   0x3   :  { %p74_p1 = scmp.lt.u32.totalorder %s70_s10, %s154_s0 }
   0x5   :  { %p76_p2 = pnand %p74_p1, %p71_p0 }
   0x7   :  { %79 = shalt.err (!%p76_p2)
}
   0x8   :  { %s80_s15 = scalar_lea.vmem %s15_s7, 1024  ;;  %p85_p4 = scmp.lt.s32.totalorder %s15_s7, %s15_s7 }
   0x9   :  { %p81_p3 = scmp.ne.s32.totalorder %s15_s7, %s80_s15  ;;  %p86_p5 = scmp.lt.s32.totalorder %s80_s15, %s80_s15 }
   0xb   :  { %p87_p6 = por %p86_p5, %p85_p4 }
   0xd   :  { %p88_p7 = pnand %p87_p6, %p81_p3 }
   0xf   :  { %91 = shalt.err (!%p88_p7)
}
  0x10   :  { %17 = dma.hbm_to_vmem [thread:$0]  %s154_s0, 1024, %s15_s7, [#allocation3]  }
  0x11   :  { %114 = dma.done.wait [#allocation3], 1024  }
  0x12   :  { %115 = vsyncadd [#allocation3], 4294966272  ;;  %v21_v0 = vld [vmem:[#allocation2] sm:$0xff]  ;;  %v22_v1 = vld [vmem:[#allocation2 + $0x8] sm:$0xff]  ;;  %s119_s18 = smov [#allocation5]  }
  0x13   :  { %v23_v2 = vld [vmem:[#allocation2 + $0x10] sm:$0xff]  ;;  %v29_v3 = vmul.f32 0.2, %v21_v0  ;;  %v30_v4 = vmul.f32 0.2, %v22_v1  ;;  %v24_v6 = vld [vmem:[#allocation2 + $0x18] sm:$0xff] }
  0x14   :  { %v31_v5 = vmul.f32 0.2, %v23_v2  ;;  %v25_v7 = vld [vmem:[#allocation2 + $0x20] sm:$0xff]  ;;  %v26_v8 = vld [vmem:[#allocation2 + $0x28] sm:$0xff]  ;;  %v32_v12 = vmul.f32 0.2, %v24_v6 }
  0x15   :  { %v37_v9 = vmax.f32 %v29_v3, %v21_v0  ;;  %v38_v10 = vmax.f32 %v30_v4, %v22_v1  ;;  %v27_v13 = vld [vmem:[#allocation2 + $0x30] sm:$0xff]  ;;  %v28_v14 = vld [vmem:[#allocation2 + $0x38] sm:$0xff]  ;;  %s59_s19 = sshll.u32 %s119_s18, 4  ;;  %v33_v15 = vmul.f32 0.2, %v25_v7  ;;  %s60_s19 = int_to_ptr.vmem [resolvable:$true] %s59_s19 }
  0x16   :  { %v39_v11 = vmax.f32 %v31_v5, %v23_v2  ;;  %v34_v16 = vmul.f32 0.2, %v26_v8  ;;  %v35_v17 = vmul.f32 0.2, %v27_v13  ;;  %v40_v18 = vmax.f32 %v32_v12, %v24_v6  ;;  %s92_s0 = scalar_lea.vmem %s60_s19, 1024  ;;  %p97_p9 = scmp.lt.s32.totalorder %s60_s19, %s60_s19 }
  0x17   :  { %45 = vst [vmem:[#allocation5] sm:$0xff] %v37_v9  ;;  %46 = vst [vmem:[#allocation5 + $0x8] sm:$0xff] %v38_v10  ;;  %v36_v19 = vmul.f32 0.2, %v28_v14  ;;  %v41_v20 = vmax.f32 %v33_v15, %v25_v7  ;;  %p93_p8 = scmp.ne.s32.totalorder %s60_s19, %s92_s0  ;;  %p98_p10 = scmp.lt.s32.totalorder %s92_s0, %s92_s0 }
  0x18   :  { %47 = vst [vmem:[#allocation5 + $0x10] sm:$0xff] %v39_v11  ;;  %v42_v21 = vmax.f32 %v34_v16, %v26_v8  ;;  %v43_v22 = vmax.f32 %v35_v17, %v27_v13  ;;  %48 = vst [vmem:[#allocation5 + $0x18] sm:$0xff] %v40_v18 }
  0x19   :  { %v44_v23 = vmax.f32 %v36_v19, %v28_v14  ;;  %49 = vst [vmem:[#allocation5 + $0x20] sm:$0xff] %v41_v20  ;;  %p99_p11 = por %p98_p10, %p97_p9 }
  0x1a   :  { %50 = vst [vmem:[#allocation5 + $0x28] sm:$0xff] %v42_v21  ;;  %51 = vst [vmem:[#allocation5 + $0x30] sm:$0xff] %v43_v22 }
  0x1b   :  { %52 = vst [vmem:[#allocation5 + $0x38] sm:$0xff] %v44_v23  ;;  %p100_p12 = pnand %p99_p11, %p93_p8 }
  0x1d   :  { %103 = shalt.err (!%p100_p12)
}
  0x1e   :  { %s104_s22 = scalar_lea.hbm %s155_s1, 1024 }
  0x1f   :  { %p105_p13 = scmp.ne.s32.totalorder %s155_s1, %s104_s22  ;;  %p108_p0 = scmp.lt.u32.totalorder %s104_s22, %s155_s1 }
  0x21   :  { %p110_p1 = pnand %p108_p0, %p105_p13 }
  0x23   :  { %113 = shalt.err (!%p110_p1)
}
  0x24   :  { %62 = dma.vmem_to_hbm [thread:$0]  %s60_s19, 1024, %s155_s1, [#allocation4]  }
  0x25   :  { %116 = dma.done.wait [#allocation4], 1024  }
  0x26   :  { %117 = vsyncadd [#allocation4], 4294966272 }
  0x27   :  { %66 = vsyncpa [#allocation3], 1 }
  0x28   :  { %67 = vsyncpa [#allocation4], 1 }

</bundles_post_ra>
